<compile_context>
chip_gen: v7x
topology: tpu7x:2x2x1
jax: 0.10.0
libtpu: 0.0.40
codegen_flags: <defaults>
</compile_context>

<pallas_src>
import functools

import jax
import jax.numpy as jnp
from jax.experimental import pallas as pl
from jax.experimental.pallas import tpu as pltpu

_MB = 1024 * 1024


def moe_kernel(x_ref, wg_ref, w1_ref, b1_ref, w2_ref, b2_ref, out_ref,
               wexp_ref, acc_ref, *, num_experts, top_k, weights_resident):
    # x_ref:  (TN, C) activations (original dtype, gate uses f32 view of it)
    # wg_ref: (C, E) f32 gate weights
    # w1_ref: (E, C, H) resident  OR  (C, H) streamed (expert e)   [compute dtype]
    # w2_ref: (E, H, C) resident  OR  (H, C) streamed (expert e)   [compute dtype]
    # b1_ref: (E, H) f32 ; b2_ref: (E, C) f32
    # out_ref: (TN, C)
    # wexp_ref: (E, TN, 1) f32 scratch — combined gate weight per (expert, token)
    # acc_ref:  (TN, C)   f32 scratch — output accumulator
    e = pl.program_id(1)
    x = x_ref[...]

    # ---- Gate (once per token tile, f32): softmax -> top-k -> renormalize ----
    @pl.when(e == 0)
    def _():
        tn = x.shape[0]
        xg = x.astype(jnp.float32)
        logits = jnp.dot(xg, wg_ref[...], preferred_element_type=jnp.float32)  # (TN, E)
        mx = jnp.max(logits, axis=-1, keepdims=True)
        ex = jnp.exp(logits - mx)
        probs = ex / jnp.sum(ex, axis=-1, keepdims=True)                        # (TN, E) f32

        e_iota = jax.lax.broadcasted_iota(jnp.int32, probs.shape, 1)
        remaining = probs
        sel_mask = jnp.zeros(probs.shape, dtype=jnp.bool_)
        sel_sum = jnp.zeros((tn, 1), dtype=jnp.float32)
        for _ in range(top_k):
            cur_max = jnp.max(remaining, axis=-1, keepdims=True)
            # first (lowest-index) occurrence of the max, like torch.topk tie-break
            cand = jnp.where(remaining == cur_max, e_iota, num_experts)
            first_idx = jnp.min(cand, axis=-1, keepdims=True)
            onehot = e_iota == first_idx
            sel_mask = jnp.logical_or(sel_mask, onehot)
            sel_sum = sel_sum + cur_max
            remaining = jnp.where(onehot, -jnp.inf, remaining)

        combined = jnp.where(sel_mask, probs, 0.0) / sel_sum                    # (TN, E) f32
        # Round-trip through the activation dtype to mirror PyTorch's .type_as(x),
        # then keep f32 for accumulation.
        combined = combined.astype(out_ref.dtype).astype(jnp.float32)

        # Stash per-expert columns along a LEADING expert axis so the per-expert
        # step below only does a cheap dynamic first-axis load (no iota / select /
        # cross-lane reduce inside the MXU-critical loop).  Runs once per tile;
        # E is small so this static unroll is negligible.
        for j in range(num_experts):
            wexp_ref[j] = jnp.sum(jnp.where(e_iota == j, combined, 0.0),
                                  axis=-1, keepdims=True)                       # (TN, 1)
        acc_ref[...] = jnp.zeros_like(acc_ref)

    # ---- Expert e: FFN (C -> 4C -> C), bf16 matmuls, f32 accumulation ----
    if weights_resident:
        w1 = w1_ref[e]                      # (C, H) — weights stay in VMEM, no re-DMA
        w2 = w2_ref[e]                      # (H, C)
    else:
        w1 = w1_ref[...]                    # (C, H) — streamed per expert
        w2 = w2_ref[...]                    # (H, C)
    b1 = b1_ref[pl.ds(e, 1), :]             # (1, H) f32
    b2 = b2_ref[pl.ds(e, 1), :]             # (1, C) f32

    xc = x.astype(w1.dtype)                 # bf16 LHS for native MXU rate
    h = jnp.dot(xc, w1, preferred_element_type=jnp.float32) + b1
    h = jnp.maximum(h, 0.0)                 # elementwise kept in f32 (v5e-friendly)
    y = jnp.dot(h.astype(w2.dtype), w2, preferred_element_type=jnp.float32) + b2

    acc_ref[...] += wexp_ref[e] * y         # (TN,1) * (TN,C), f32

    @pl.when(e == num_experts - 1)
    def _():
        out_ref[...] = acc_ref[...].astype(out_ref.dtype)


def _round_up(n, m):
    return ((n + m - 1) // m) * m


def _weight_spec(block_shape, index_map, buffers):
    # Guarded deep-buffering of the streamed weight pipeline (perf review: v6e).
    if buffers > 2 and hasattr(pl, "Buffered"):
        try:
            return pl.BlockSpec(block_shape, index_map,
                                pipeline_mode=pl.Buffered(buffers))
        except TypeError:
            pass
    return pl.BlockSpec(block_shape, index_map)


def mixture_of_experts(x, params, *, num_experts, top_k, token_tile=None,
                       compute_dtype=jnp.bfloat16, weights_resident=None):
    B, T, C = x.shape
    N = B * T
    E = num_experts
    H = params["w1"].shape[-1]
    out_dtype = x.dtype

    # ---- Generation-aware VMEM budget (don't hard-code 64 MiB) ----
    try:
        vmem_cap = int(pltpu.get_tpu_info().vmem_capacity_bytes)
    except Exception:
        vmem_cap = 64 * _MB                 # conservative (v7x-sized) fallback
    vmem_budget = int(0.85 * vmem_cap)

    # ---- Generation-aware token tile (HBM->MXU ridge-point sizing) ----
    if token_tile is None:
        token_tile = 512 if vmem_cap <= 80 * _MB else 1024   # v7x : v5e/v6e
        # TODO(synk): distinguish v5e (256 is enough) from v6e once the chip
        #             version is exposed; both report 128 MiB VMEM.
    token_tile = min(token_tile, _round_up(N, 8))

    cd_item = jnp.dtype(compute_dtype).itemsize
    x_item = jnp.dtype(x.dtype).itemsize
    o_item = jnp.dtype(out_dtype).itemsize
    per_expert_w = (C * H + H * C) * cd_item
    all_w = E * per_expert_w

    def footprint(tt, resident, wbuf):
        f = 2 * tt * C * x_item                      # x tile, double-buffered
        f += 2 * tt * C * o_item                     # out tile, double-buffered
        f += 2 * (C * E + E * H + E * C) * 4         # gate weight + biases (f32)
        f += E * tt * 128 * 4                        # (E,TN,1) scratch, lane-padded
        f += tt * C * 4                              # f32 accumulator scratch
        f += tt * H * 4                              # hidden activation headroom
        f += (2 * all_w) if resident else (wbuf * per_expert_w)
        return f + 4 * _MB                           # slack

    # ---- Weight residency: fetch expert weights once when they fit ----
    if weights_resident is None:
        weights_resident = footprint(token_tile, True, 2) <= vmem_budget

    # ---- Deeper weight-stream pipelining only when it pays off and fits ----
    weight_buffers = 2
    if (not weights_resident and per_expert_w >= 2 * _MB
            and vmem_cap >= 100 * _MB
            and footprint(token_tile, False, 3) <= vmem_budget):
        weight_buffers = 3

    # Shrink the token tile if the streamed footprint still overflows the budget.
    while (not weights_resident and token_tile > 256
           and footprint(token_tile, False, weight_buffers) > vmem_budget):
        token_tile = max(256, _round_up(token_tile // 2, 8))

    est = footprint(token_tile, weights_resident, weight_buffers)
    vmem_limit = int(min(vmem_budget, max(est, 32 * _MB)))

    # ---- Pad tokens, cast weights ----
    x_flat = x.reshape(N, C)
    pad = (-N) % token_tile
    if pad:
        x_flat = jnp.pad(x_flat, ((0, pad), (0, 0)))
    Np = x_flat.shape[0]

    wg = params["wg"].astype(jnp.float32)        # gate stays f32 (top-k stability)
    w1 = params["w1"].astype(compute_dtype)      # bf16 FFN weights -> native MXU,
    w2 = params["w2"].astype(compute_dtype)      # half the HBM/VMEM traffic
    b1 = params["b1"].astype(jnp.float32)
    b2 = params["b2"].astype(jnp.float32)

    if weights_resident:
        w1_spec = pl.BlockSpec((E, C, H), lambda i, e: (0, 0, 0))   # fetched once
        w2_spec = pl.BlockSpec((E, H, C), lambda i, e: (0, 0, 0))
    else:
        w1_spec = _weight_spec((None, C, H), lambda i, e: (e, 0, 0), weight_buffers)
        w2_spec = _weight_spec((None, H, C), lambda i, e: (e, 0, 0), weight_buffers)

    kernel = functools.partial(moe_kernel, num_experts=E, top_k=top_k,
                               weights_resident=weights_resident)
    out = pl.pallas_call(
        kernel,
        out_shape=jax.ShapeDtypeStruct((Np, C), out_dtype),
        grid_spec=pltpu.PrefetchScalarGridSpec(
            num_scalar_prefetch=0,
            grid=(Np // token_tile, E),
            in_specs=[
                pl.BlockSpec((token_tile, C), lambda i, e: (i, 0)),   # x tile
                pl.BlockSpec((C, E), lambda i, e: (0, 0)),            # gate weight
                w1_spec,                                              # W1 (resident/streamed)
                pl.BlockSpec((E, H), lambda i, e: (0, 0)),            # all b1 (tiny)
                w2_spec,                                              # W2 (resident/streamed)
                pl.BlockSpec((E, C), lambda i, e: (0, 0)),            # all b2 (tiny)
            ],
            out_specs=pl.BlockSpec((token_tile, C), lambda i, e: (i, 0)),
            scratch_shapes=[
                pltpu.VMEM((E, token_tile, 1), jnp.float32),  # per-expert gate weights
                pltpu.VMEM((token_tile, C), jnp.float32),     # f32 accumulator
            ],
        ),
        compiler_params=pltpu.CompilerParams(
            dimension_semantics=("parallel", "arbitrary"),
            vmem_limit_bytes=vmem_limit,
        ),
    )(x_flat, wg, w1, b1, w2, b2)
    return out[:N].reshape(B, T, C)


def init_params(key, num_experts, embedding_dim):
    C = embedding_dim
    H = 4 * embedding_dim
    k = jax.random.split(key, 5)
    s1 = 1.0 / (C ** 0.5)
    s2 = 1.0 / (H ** 0.5)
    return dict(
        wg=jax.random.uniform(k[0], (C, num_experts), jnp.float32, -s1, s1),
        w1=jax.random.uniform(k[1], (num_experts, C, H), jnp.float32, -s1, s1),
        b1=jax.random.uniform(k[2], (num_experts, H), jnp.float32, -s1, s1),
        w2=jax.random.uniform(k[3], (num_experts, H, C), jnp.float32, -s2, s2),
        b2=jax.random.uniform(k[4], (num_experts, C), jnp.float32, -s2, s2),
    )


def moe_reference(x, params, *, num_experts, top_k):
    # Pure-JAX reference mirroring the PyTorch forward (f32 throughout).
    B, T, C = x.shape
    xf = x.reshape(-1, C)
    logits = xf @ params["wg"]
    probs = jax.nn.softmax(logits.astype(jnp.float32), axis=-1)
    topw, topi = jax.lax.top_k(probs, top_k)
    topw = (topw / jnp.sum(topw, axis=-1, keepdims=True)).astype(x.dtype)
    out = jnp.zeros_like(xf)
    for e in range(num_experts):
        h = jnp.maximum(xf @ params["w1"][e] + params["b1"][e], 0.0)
        y = h @ params["w2"][e] + params["b2"][e]
        w_e = jnp.sum(jnp.where(topi == e, topw, 0.0), axis=-1, keepdims=True)
        out = out + w_e * y
    return out.reshape(B, T, C)


if __name__ == "__main__":
    NUM_EXPERTS = 4
    TOP_K = 2
    EMBED = 32
    B, T = 2, 8

    key = jax.random.PRNGKey(0)
    kx, kp = jax.random.split(key)
    x = jax.random.normal(kx, (B, T, EMBED), dtype=jnp.float32)
    params = init_params(kp, NUM_EXPERTS, EMBED)

    ref = moe_reference(x, params, num_experts=NUM_EXPERTS, top_k=TOP_K)

    # Path 1: expert weights resident in VMEM (auto-selected for small models).
    out_res = mixture_of_experts(x, params, num_experts=NUM_EXPERTS, top_k=TOP_K)
    out_res = jax.block_until_ready(out_res)
    assert out_res.shape == (B, T, EMBED)
    assert jnp.allclose(out_res, ref, rtol=5e-2, atol=5e-2), "resident path mismatch"

    # Path 2: per-expert weight streaming (large-model configuration).
    out_str = mixture_of_experts(x, params, num_experts=NUM_EXPERTS, top_k=TOP_K,
                                 weights_resident=False)
    out_str = jax.block_until_ready(out_str)
    assert jnp.allclose(out_str, ref, rtol=5e-2, atol=5e-2), "streamed path mismatch"

    print("KERNEL_OK")
</pallas_src>

<mosaic_0001>
module attributes {stable_mosaic.version = 11 : i64} {
  func.func @moe_kernel(%arg0: i32, %arg1: i32, %arg2: memref<16x32xf32, #tpu.memory_space<vmem>>, %arg3: memref<32x4xf32, #tpu.memory_space<vmem>>, %arg4: memref<4x32x128xbf16, #tpu.memory_space<vmem>>, %arg5: memref<4x128xf32, #tpu.memory_space<vmem>>, %arg6: memref<4x128x32xbf16, #tpu.memory_space<vmem>>, %arg7: memref<4x32xf32, #tpu.memory_space<vmem>>, %arg8: memref<16x32xf32, #tpu.memory_space<vmem>>, %arg9: memref<4x16x1xf32, #tpu.memory_space<vmem>>, %arg10: memref<16x32xf32, #tpu.memory_space<vmem>>) attributes {dimension_semantics = [#tpu.dimension_semantics<parallel>, #tpu.dimension_semantics<arbitrary>], iteration_bounds = array<i64: 1, 4>, scalar_prefetch = 0 : i64, scratch_operands = 2 : i64, tpu.core_type = #tpu.core_type<tc>, window_params = [{transform_indices = @transform_0, window_bounds = array<i64: 16, 32>}, {pipeline_mode = #tpu.pipeline_mode<synchronous>, transform_indices = @transform_1, window_bounds = array<i64: 32, 4>}, {pipeline_mode = #tpu.pipeline_mode<synchronous>, transform_indices = @transform_2, window_bounds = array<i64: 4, 32, 128>}, {pipeline_mode = #tpu.pipeline_mode<synchronous>, transform_indices = @transform_3, window_bounds = array<i64: 4, 128>}, {pipeline_mode = #tpu.pipeline_mode<synchronous>, transform_indices = @transform_4, window_bounds = array<i64: 4, 128, 32>}, {pipeline_mode = #tpu.pipeline_mode<synchronous>, transform_indices = @transform_5, window_bounds = array<i64: 4, 32>}, {transform_indices = @transform_6, window_bounds = array<i64: 16, 32>}]} {
    %c0 = arith.constant 0 : index
    %c0_0 = arith.constant 0 : index
    %0 = vector.load %arg2[%c0, %c0_0] : memref<16x32xf32, #tpu.memory_space<vmem>>, vector<16x32xf32>
    %c0_i32 = arith.constant 0 : i32
    %1 = arith.cmpi eq, %arg1, %c0_i32 : i32
    %2 = arith.extui %1 : i1 to i32
    %c0_i32_1 = arith.constant 0 : i32
    %3 = arith.cmpi ne, %2, %c0_i32_1 : i32
    scf.if %3 {
      %c0_17 = arith.constant 0 : index
      %c0_18 = arith.constant 0 : index
      %35 = vector.load %arg3[%c0_17, %c0_18] : memref<32x4xf32, #tpu.memory_space<vmem>>, vector<32x4xf32>
      %cst_19 = arith.constant dense<0.000000e+00> : vector<16x4xf32>
      %36 = tpu.matmul %0, %35, %cst_19 {dimension_numbers = #tpu.dot_dimension_numbers<[1], [0], [0], [1], [0, 0, 1, 1], [], []>} : vector<16x32xf32>, vector<32x4xf32>, vector<16x4xf32> -> vector<16x4xf32>
      %cst_20 = arith.constant dense<0xFF800000> : vector<16xf32>
      %37 = vector.multi_reduction <maximumf>, %36, %cst_20 [1] : vector<16x4xf32> to vector<16xf32>
      %38 = vector.shape_cast %37 : vector<16xf32> to vector<16x1xf32>
      %39 = vector.broadcast %38 : vector<16x1xf32> to vector<16x4xf32>
      %40 = arith.subf %36, %39 : vector<16x4xf32>
      %41 = math.exp %40 : vector<16x4xf32>
      %cst_21 = arith.constant dense<0.000000e+00> : vector<16xf32>
      %42 = vector.multi_reduction <add>, %41, %cst_21 [1] : vector<16x4xf32> to vector<16xf32>
      %43 = vector.shape_cast %42 : vector<16xf32> to vector<16x1xf32>
      %44 = vector.broadcast %43 : vector<16x1xf32> to vector<16x4xf32>
      %45 = arith.divf %41, %44 : vector<16x4xf32>
      %46 = tpu.iota {dimensions = array<i32: 1>} : vector<16x4xi32>
      %false = arith.constant false
      %47 = vector.broadcast %false : i1 to vector<16x4xi1>
      %cst_22 = arith.constant 0.000000e+00 : f32
      %48 = vector.broadcast %cst_22 : f32 to vector<16x1xf32>
      %cst_23 = arith.constant dense<0xFF800000> : vector<16xf32>
      %49 = vector.multi_reduction <maximumf>, %45, %cst_23 [1] : vector<16x4xf32> to vector<16xf32>
      %50 = vector.shape_cast %49 : vector<16xf32> to vector<16x1xf32>
      %51 = vector.broadcast %50 : vector<16x1xf32> to vector<16x4xf32>
      %52 = arith.cmpf oeq, %45, %51 : vector<16x4xf32>
      %c4_i32 = arith.constant 4 : i32
      %53 = vector.broadcast %c4_i32 : i32 to vector<16x4xi32>
      %54 = arith.select %52, %46, %53 : vector<16x4xi1>, vector<16x4xi32>
      %cst_24 = arith.constant dense<2147483647> : vector<16xi32>
      %55 = vector.multi_reduction <minsi>, %54, %cst_24 [1] : vector<16x4xi32> to vector<16xi32>
      %56 = vector.shape_cast %55 : vector<16xi32> to vector<16x1xi32>
      %57 = vector.broadcast %56 : vector<16x1xi32> to vector<16x4xi32>
      %58 = arith.cmpi eq, %46, %57 : vector<16x4xi32>
      %59 = arith.ori %47, %58 : vector<16x4xi1>
      %60 = arith.addf %48, %50 : vector<16x1xf32>
      %cst_25 = arith.constant 0xFF800000 : f32
      %61 = vector.broadcast %cst_25 : f32 to vector<16x4xf32>
      %62 = arith.select %58, %61, %45 : vector<16x4xi1>, vector<16x4xf32>
      %cst_26 = arith.constant dense<0xFF800000> : vector<16xf32>
      %63 = vector.multi_reduction <maximumf>, %62, %cst_26 [1] : vector<16x4xf32> to vector<16xf32>
      %64 = vector.shape_cast %63 : vector<16xf32> to vector<16x1xf32>
      %65 = vector.broadcast %64 : vector<16x1xf32> to vector<16x4xf32>
      %66 = arith.cmpf oeq, %62, %65 : vector<16x4xf32>
      %c4_i32_27 = arith.constant 4 : i32
      %67 = vector.broadcast %c4_i32_27 : i32 to vector<16x4xi32>
      %68 = arith.select %66, %46, %67 : vector<16x4xi1>, vector<16x4xi32>
      %cst_28 = arith.constant dense<2147483647> : vector<16xi32>
      %69 = vector.multi_reduction <minsi>, %68, %cst_28 [1] : vector<16x4xi32> to vector<16xi32>
      %70 = vector.shape_cast %69 : vector<16xi32> to vector<16x1xi32>
      %71 = vector.broadcast %70 : vector<16x1xi32> to vector<16x4xi32>
      %72 = arith.cmpi eq, %46, %71 : vector<16x4xi32>
      %73 = arith.ori %59, %72 : vector<16x4xi1>
      %74 = arith.addf %60, %64 : vector<16x1xf32>
      %cst_29 = arith.constant 0.000000e+00 : f32
      %75 = vector.broadcast %cst_29 : f32 to vector<16x4xf32>
      %76 = arith.select %73, %45, %75 : vector<16x4xi1>, vector<16x4xf32>
      %77 = vector.broadcast %74 : vector<16x1xf32> to vector<16x4xf32>
      %78 = arith.divf %76, %77 : vector<16x4xf32>
      %c0_i32_30 = arith.constant 0 : i32
      %79 = vector.broadcast %c0_i32_30 : i32 to vector<16x4xi32>
      %80 = arith.cmpi eq, %46, %79 : vector<16x4xi32>
      %cst_31 = arith.constant 0.000000e+00 : f32
      %81 = vector.broadcast %cst_31 : f32 to vector<16x4xf32>
      %82 = arith.select %80, %78, %81 : vector<16x4xi1>, vector<16x4xf32>
      %cst_32 = arith.constant dense<0.000000e+00> : vector<16xf32>
      %83 = vector.multi_reduction <add>, %82, %cst_32 [1] : vector<16x4xf32> to vector<16xf32>
      %84 = vector.shape_cast %83 : vector<16xf32> to vector<16x1xf32>
      %c0_33 = arith.constant 0 : index
      %c0_34 = arith.constant 0 : index
      %c0_35 = arith.constant 0 : index
      %85 = vector.load %arg9[%c0_33, %c0_34, %c0_35] : memref<4x16x1xf32, #tpu.memory_space<vmem>>, vector<1x16x1xf32>
      %86 = vector.shape_cast %85 : vector<1x16x1xf32> to vector<16x1xf32>
      %87 = vector.shape_cast %84 : vector<16x1xf32> to vector<1x16x1xf32>
      tpu.vector_store %arg9[%c0_33, %c0_34, %c0_35], %87 {strides = array<i32>} : memref<4x16x1xf32, #tpu.memory_space<vmem>>, vector<1x16x1xf32>,
      %c1_i32 = arith.constant 1 : i32
      %88 = vector.broadcast %c1_i32 : i32 to vector<16x4xi32>
      %89 = arith.cmpi eq, %46, %88 : vector<16x4xi32>
      %cst_36 = arith.constant 0.000000e+00 : f32
      %90 = vector.broadcast %cst_36 : f32 to vector<16x4xf32>
      %91 = arith.select %89, %78, %90 : vector<16x4xi1>, vector<16x4xf32>
      %cst_37 = arith.constant dense<0.000000e+00> : vector<16xf32>
      %92 = vector.multi_reduction <add>, %91, %cst_37 [1] : vector<16x4xf32> to vector<16xf32>
      %93 = vector.shape_cast %92 : vector<16xf32> to vector<16x1xf32>
      %c1 = arith.constant 1 : index
      %c0_38 = arith.constant 0 : index
      %c0_39 = arith.constant 0 : index
      %94 = vector.load %arg9[%c1, %c0_38, %c0_39] : memref<4x16x1xf32, #tpu.memory_space<vmem>>, vector<1x16x1xf32>
      %95 = vector.shape_cast %94 : vector<1x16x1xf32> to vector<16x1xf32>
      %96 = vector.shape_cast %93 : vector<16x1xf32> to vector<1x16x1xf32>
      tpu.vector_store %arg9[%c1, %c0_38, %c0_39], %96 {strides = array<i32>} : memref<4x16x1xf32, #tpu.memory_space<vmem>>, vector<1x16x1xf32>,
      %c2_i32 = arith.constant 2 : i32
      %97 = vector.broadcast %c2_i32 : i32 to vector<16x4xi32>
      %98 = arith.cmpi eq, %46, %97 : vector<16x4xi32>
      %cst_40 = arith.constant 0.000000e+00 : f32
      %99 = vector.broadcast %cst_40 : f32 to vector<16x4xf32>
      %100 = arith.select %98, %78, %99 : vector<16x4xi1>, vector<16x4xf32>
      %cst_41 = arith.constant dense<0.000000e+00> : vector<16xf32>
      %101 = vector.multi_reduction <add>, %100, %cst_41 [1] : vector<16x4xf32> to vector<16xf32>
      %102 = vector.shape_cast %101 : vector<16xf32> to vector<16x1xf32>
      %c2 = arith.constant 2 : index
      %c0_42 = arith.constant 0 : index
      %c0_43 = arith.constant 0 : index
      %103 = vector.load %arg9[%c2, %c0_42, %c0_43] : memref<4x16x1xf32, #tpu.memory_space<vmem>>, vector<1x16x1xf32>
      %104 = vector.shape_cast %103 : vector<1x16x1xf32> to vector<16x1xf32>
      %105 = vector.shape_cast %102 : vector<16x1xf32> to vector<1x16x1xf32>
      tpu.vector_store %arg9[%c2, %c0_42, %c0_43], %105 {strides = array<i32>} : memref<4x16x1xf32, #tpu.memory_space<vmem>>, vector<1x16x1xf32>,
      %c3_i32_44 = arith.constant 3 : i32
      %106 = vector.broadcast %c3_i32_44 : i32 to vector<16x4xi32>
      %107 = arith.cmpi eq, %46, %106 : vector<16x4xi32>
      %cst_45 = arith.constant 0.000000e+00 : f32
      %108 = vector.broadcast %cst_45 : f32 to vector<16x4xf32>
      %109 = arith.select %107, %78, %108 : vector<16x4xi1>, vector<16x4xf32>
      %cst_46 = arith.constant dense<0.000000e+00> : vector<16xf32>
      %110 = vector.multi_reduction <add>, %109, %cst_46 [1] : vector<16x4xf32> to vector<16xf32>
      %111 = vector.shape_cast %110 : vector<16xf32> to vector<16x1xf32>
      %c3 = arith.constant 3 : index
      %c0_47 = arith.constant 0 : index
      %c0_48 = arith.constant 0 : index
      %112 = vector.load %arg9[%c3, %c0_47, %c0_48] : memref<4x16x1xf32, #tpu.memory_space<vmem>>, vector<1x16x1xf32>
      %113 = vector.shape_cast %112 : vector<1x16x1xf32> to vector<16x1xf32>
      %114 = vector.shape_cast %111 : vector<16x1xf32> to vector<1x16x1xf32>
      tpu.vector_store %arg9[%c3, %c0_47, %c0_48], %114 {strides = array<i32>} : memref<4x16x1xf32, #tpu.memory_space<vmem>>, vector<1x16x1xf32>,
      %cst_49 = arith.constant 0.000000e+00 : f32
      %115 = vector.broadcast %cst_49 : f32 to vector<16x32xf32>
      %c0_50 = arith.constant 0 : index
      %c0_51 = arith.constant 0 : index
      %116 = vector.load %arg10[%c0_50, %c0_51] : memref<16x32xf32, #tpu.memory_space<vmem>>, vector<16x32xf32>
      tpu.vector_store %arg10[%c0_50, %c0_51], %115 {strides = array<i32>} : memref<16x32xf32, #tpu.memory_space<vmem>>, vector<16x32xf32>,
    } else {
    }
    %4 = arith.index_cast %arg1 : i32 to index
    %c0_2 = arith.constant 0 : index
    %c0_3 = arith.constant 0 : index
    %5 = vector.load %arg4[%4, %c0_2, %c0_3] : memref<4x32x128xbf16, #tpu.memory_space<vmem>>, vector<1x32x128xbf16>
    %6 = vector.shape_cast %5 : vector<1x32x128xbf16> to vector<32x128xbf16>
    %7 = arith.index_cast %arg1 : i32 to index
    %c0_4 = arith.constant 0 : index
    %c0_5 = arith.constant 0 : index
    %8 = vector.load %arg6[%7, %c0_4, %c0_5] : memref<4x128x32xbf16, #tpu.memory_space<vmem>>, vector<1x128x32xbf16>
    %9 = vector.shape_cast %8 : vector<1x128x32xbf16> to vector<128x32xbf16>
    %10 = arith.index_cast %arg1 : i32 to index
    %c0_6 = arith.constant 0 : index
    %11 = vector.load %arg5[%10, %c0_6] : memref<4x128xf32, #tpu.memory_space<vmem>>, vector<1x128xf32>
    %12 = arith.index_cast %arg1 : i32 to index
    %c0_7 = arith.constant 0 : index
    %13 = vector.load %arg7[%12, %c0_7] : memref<4x32xf32, #tpu.memory_space<vmem>>, vector<1x32xf32>
    %14 = arith.truncf %0 : vector<16x32xf32> to vector<16x32xbf16>
    %cst = arith.constant dense<0.000000e+00> : vector<16x128xf32>
    %15 = tpu.matmul %14, %6, %cst {dimension_numbers = #tpu.dot_dimension_numbers<[1], [0], [0], [1], [0, 0, 1, 1], [], []>} : vector<16x32xbf16>, vector<32x128xbf16>, vector<16x128xf32> -> vector<16x128xf32>
    %16 = vector.broadcast %11 : vector<1x128xf32> to vector<16x128xf32>
    %17 = arith.addf %15, %16 : vector<16x128xf32>
    %cst_8 = arith.constant 0.000000e+00 : f32
    %18 = vector.broadcast %cst_8 : f32 to vector<16x128xf32>
    %19 = arith.maximumf %17, %18 : vector<16x128xf32>
    %20 = arith.truncf %19 : vector<16x128xf32> to vector<16x128xbf16>
    %cst_9 = arith.constant dense<0.000000e+00> : vector<16x32xf32>
    %21 = tpu.matmul %20, %9, %cst_9 {dimension_numbers = #tpu.dot_dimension_numbers<[1], [0], [0], [1], [0, 0, 1, 1], [], []>} : vector<16x128xbf16>, vector<128x32xbf16>, vector<16x32xf32> -> vector<16x32xf32>
    %22 = vector.broadcast %13 : vector<1x32xf32> to vector<16x32xf32>
    %23 = arith.addf %21, %22 : vector<16x32xf32>
    %c0_10 = arith.constant 0 : index
    %c0_11 = arith.constant 0 : index
    %24 = vector.load %arg10[%c0_10, %c0_11] : memref<16x32xf32, #tpu.memory_space<vmem>>, vector<16x32xf32>
    %25 = arith.index_cast %arg1 : i32 to index
    %c0_12 = arith.constant 0 : index
    %c0_13 = arith.constant 0 : index
    %26 = vector.load %arg9[%25, %c0_12, %c0_13] : memref<4x16x1xf32, #tpu.memory_space<vmem>>, vector<1x16x1xf32>
    %27 = vector.shape_cast %26 : vector<1x16x1xf32> to vector<16x1xf32>
    %28 = vector.broadcast %27 : vector<16x1xf32> to vector<16x32xf32>
    %29 = arith.mulf %28, %23 : vector<16x32xf32>
    %30 = arith.addf %24, %29 : vector<16x32xf32>
    %c0_14 = arith.constant 0 : index
    %c0_15 = arith.constant 0 : index
    %31 = vector.load %arg10[%c0_14, %c0_15] : memref<16x32xf32, #tpu.memory_space<vmem>>, vector<16x32xf32>
    tpu.vector_store %arg10[%c0_14, %c0_15], %30 {strides = array<i32>} : memref<16x32xf32, #tpu.memory_space<vmem>>, vector<16x32xf32>,
    %c3_i32 = arith.constant 3 : i32
    %32 = arith.cmpi eq, %arg1, %c3_i32 : i32
    %33 = arith.extui %32 : i1 to i32
    %c0_i32_16 = arith.constant 0 : i32
    %34 = arith.cmpi ne, %33, %c0_i32_16 : i32
    scf.if %34 {
      %c0_17 = arith.constant 0 : index
      %c0_18 = arith.constant 0 : index
      %35 = vector.load %arg10[%c0_17, %c0_18] : memref<16x32xf32, #tpu.memory_space<vmem>>, vector<16x32xf32>
      %c0_19 = arith.constant 0 : index
      %c0_20 = arith.constant 0 : index
      %36 = vector.load %arg8[%c0_19, %c0_20] : memref<16x32xf32, #tpu.memory_space<vmem>>, vector<16x32xf32>
      tpu.vector_store %arg8[%c0_19, %c0_20], %35 {strides = array<i32>} : memref<16x32xf32, #tpu.memory_space<vmem>>, vector<16x32xf32>,
    } else {
    }
    return
  }
  func.func @transform_0(%arg0: i32, %arg1: i32) -> (i32, i32) {
    %c0_i32 = arith.constant 0 : i32
    %c0_i32_0 = arith.constant 0 : i32
    return %arg0, %c0_i32 : i32, i32
  }
  func.func @transform_1(%arg0: i32, %arg1: i32) -> (i32, i32) {
    %c0_i32 = arith.constant 0 : i32
    %c0_i32_0 = arith.constant 0 : i32
    %c0_i32_1 = arith.constant 0 : i32
    return %c0_i32, %c0_i32_0 : i32, i32
  }
  func.func @transform_2(%arg0: i32, %arg1: i32) -> (i32, i32, i32) {
    %c0_i32 = arith.constant 0 : i32
    %c0_i32_0 = arith.constant 0 : i32
    %c0_i32_1 = arith.constant 0 : i32
    %c0_i32_2 = arith.constant 0 : i32
    return %c0_i32, %c0_i32_0, %c0_i32_1 : i32, i32, i32
  }
  func.func @transform_3(%arg0: i32, %arg1: i32) -> (i32, i32) {
    %c0_i32 = arith.constant 0 : i32
    %c0_i32_0 = arith.constant 0 : i32
    %c0_i32_1 = arith.constant 0 : i32
    return %c0_i32, %c0_i32_0 : i32, i32
  }
  func.func @transform_4(%arg0: i32, %arg1: i32) -> (i32, i32, i32) {
    %c0_i32 = arith.constant 0 : i32
    %c0_i32_0 = arith.constant 0 : i32
    %c0_i32_1 = arith.constant 0 : i32
    %c0_i32_2 = arith.constant 0 : i32
    return %c0_i32, %c0_i32_0, %c0_i32_1 : i32, i32, i32
  }
  func.func @transform_5(%arg0: i32, %arg1: i32) -> (i32, i32) {
    %c0_i32 = arith.constant 0 : i32
    %c0_i32_0 = arith.constant 0 : i32
    %c0_i32_1 = arith.constant 0 : i32
    return %c0_i32, %c0_i32_0 : i32, i32
  }
  func.func @transform_6(%arg0: i32, %arg1: i32) -> (i32, i32) {
    %c0_i32 = arith.constant 0 : i32
    %c0_i32_0 = arith.constant 0 : i32
    return %arg0, %c0_i32 : i32, i32
  }
}

</mosaic_0001>

<bundles_post_ra>
// kernel: tpu_custom_call.1
= control target key start
LH: loop header
LB: loop body
LE: loop exit
PB: predicated region body
PF: predicated region fallthrough
CT: control target
= control target key end

     0   :  { %11 = vsyncpa [#allocation5], 0  ;;  %s1066_s21 = smov 0   ;;  %s1068_s22 = smov 0   ;;  %s1257_s0 = inlined_call_operand.vmem [shape: f32[16,32], index: 0, kind: input, shape index: {}]   ;;  %s1258_s1 = inlined_call_operand.vmem [shape: f32[32,4], index: 1, kind: input, shape index: {}]   ;;  %s1259_s2 = inlined_call_operand.vmem [shape: bf16[4,32,128], index: 2, kind: input, shape index: {}]   ;;  %s1260_s3 = inlined_call_operand.vmem [shape: f32[4,128], index: 3, kind: input, shape index: {}]   ;;  %s1261_s4 = inlined_call_operand.vmem [shape: bf16[4,128,32], index: 4, kind: input, shape index: {}]   ;;  %s1262_s5 = inlined_call_operand.vmem [shape: f32[4,32], index: 5, kind: input, shape index: {}]   ;;  %s1263_s6 = inlined_call_operand.hbm [shape: f32[16,32], index: 6, kind: output, shape index: {}]  }
   0x1   :  { %s1070_s23 = smov 0  }
   0x2 LB: > { %s814_s24 = sadd.s32 4294967295, %s1022_s23   ;;  %s26_s25 = sadd.s32 1, %s1018_s22  ;;  %s1022_s23 = sphi %s1070_s23, %s17_s23   ;;  %s1018_s22 = sphi %s1068_s22, %s1266_s22   ;;  %s1014_s21 = sphi %s1066_s21, %s1265_s21  }
   0x3   : > { %p27_p0 = scmp.ge.s32.totalorder %s26_s25, 4  ;;  %p817_p1 = scmp.ge.s32.totalorder %s1022_s23, 1 }
   0x4   : > { %p226_p2 = scmp.lt.s32.totalorder %s1022_s23, 5 }
   0x5   : > { %s1268_s25 = smov (%p27_p0, %s26_s25), 0 }
   0x6   : > { %p227_p3 = pnand %p817_p1, %p226_p2 }
   0x7   : > { %v1090_v0 = vld [vmem:[%s1257_s0] sm:$0xff] (!%p227_p3)  ;;  %v1095_v1 = vld [vmem:[%s1257_s0 + $0x8] sm:$0xff] (!%p227_p3)  ;;  %p818_p4 = scmp.ne.s32.totalorder (!%p227_p3), %s1014_s21, 0 }
   0x8   : > { %230 = sbr.rel (%p227_p3) target bundleno = 2086 (0x826), region = 44 }
   0xf   : > { %264 = sbr.rel (%p818_p4) target bundleno = 1601 (0x641), region = 48  ;;  %v265_v2 = vld [vmem:[%s1258_s1] sm:$0xff] (!%p818_p4)  ;;  %v266_v3 = vld [vmem:[%s1258_s1 + $0x8] sm:$0xff] (!%p818_p4)  ;;  %v267_v4 = vld [vmem:[%s1258_s1 + $0x10] sm:$0xff] (!%p818_p4)  ;;  %vm269_vm0 = vcmask (!%p818_p4), 261120   ;;  %v1024_v7 = vmov (!%p818_p4), 0.0   ;;  %v374_v31 = vlaneseq (!%p818_p4) }
  0x10   : > { %v902_v5 = vpack.c.bf16 (!%p818_p4), %v266_v3, %v265_v2  ;;  %v268_v6 = vld [vmem:[%s1258_s1 + $0x18] sm:$0xff] (!%p818_p4)  ;;  %871 = vmatprep.mubr.msk.f32.mxu0 (!%p818_p4), %vm269_vm0, %v1090_v0  ;;  %522 = vst.msk [vmem:[#allocation3] sm:$0xff] (!%p818_p4), %vm269_vm0, %v1024_v7  ;;  %523 = vst.msk [vmem:[#allocation3 + $0x8] sm:$0xff] (!%p818_p4), %vm269_vm0, %v1024_v7  ;;  %vm351_vm1 = vcmask (!%p818_p4), 31744  }
  0x11   : > { %v906_v8 = vpack.c.bf16 (!%p818_p4), %v268_v6, %v267_v4  ;;  %v1124_v32 = vand.u32 (!%p818_p4), 127, %v374_v31 }
  0x12   : > { %903 = vmatprep.subr.bf16.mxu0 (!%p818_p4), %v902_v5 }
  0x13   : > { %905 = vmatpush3.bf16.msra.mxu0 (!%p818_p4), %v902_v5  ;;  %vm474_vm14 = vcmp.eq.s32.totalorder (!%p818_p4), %v1124_v32, 0 }
  0x14   : > { %907 = vmatprep.subr.bf16.mxu0 (!%p818_p4), %v906_v8 }
  0x17   : > { %909 = vmatpush3.bf16.msra.mxu0 %v906_v8 }
  0x1a   : > { %872 = vmatmul.mubr.msk.f32.vlgmr.msra.gmra.mrb[0].mxu0 %vm269_vm0, %v1095_v1  ;;  %vm486_vm0 = vcmp.eq.s32.totalorder %v1124_v32, 1 }
  0xed   : > { %v873_v9 = vpop.f32.mrb[0].mxu0 }
  0xee   : > { %v342_v10 = vpop.f32.mrb[1].mxu0  ;;  %v355_v12 = vsel %vm351_vm1, %v873_v9, -inf }
  0xef   : > { %v352_v11 = vsel %vm351_vm1, %v342_v10, -inf }
  0xf0   : > { %353 = vmax.xlane.f32.xlu0 %v352_v11 }
  0xf4   : > { %356 = vmax.xlane.f32.xlu0 %v355_v12 }
 0x17d   : > { %v354_v13 = vpop.xlane.xlu0 %353 }
 0x17e   : > { %v358_v14 = vsub.f32 %v342_v10, %v354_v13 }
 0x180   : > { %v360_v15 = vmul.f32 1.442695, %v358_v14 }
 0x181   : > { %v357_v16 = vpop.xlane.xlu0 %356 }
 0x182   : > { %947 = vpow2.f32 %v360_v15  ;;  %v359_v17 = vsub.f32 %v873_v9, %v357_v16 }
 0x184   : > { %v362_v18 = vmul.f32 1.442695, %v359_v17 }
 0x186   : > { %949 = vpow2.f32 %v362_v18 }
 0x18c   : > { %v948_v19 = vpop.eup %947 }
 0x18d   : > { %v364_v20 = vsel %vm351_vm1, %v948_v19, 0.0 }
 0x18e   : > { %365 = vadd.xlane.f32.xlu1 %v364_v20 }
 0x190   : > { %v950_v21 = vpop.eup %949 }
 0x191   : > { %v367_v22 = vsel %vm351_vm1, %v950_v21, 0.0 }
 0x192   : > { %368 = vadd.xlane.f32.xlu1 %v367_v22 }
 0x21b   : > { %v366_v23 = vpop.xlane.xlu1 %365 }
 0x21c   : > { %951 = vrcp.f32 %v366_v23 }
 0x21f   : > { %v369_v24 = vpop.xlane.xlu1 %368 }
 0x220   : > { %953 = vrcp.f32 %v369_v24 }
 0x226   : > { %v952_v25 = vpop.eup %951 }
 0x227   : > { %v1116_v26 = vmul.f32 %v952_v25, %v948_v19 }
 0x229   : > { %v376_v27 = vsel %vm351_vm1, %v1116_v26, -inf }
 0x22a   : > { %v954_v28 = vpop.eup %953  ;;  %377 = vmax.xlane.f32.xlu0 %v376_v27 }
 0x22b   : > { %v1120_v29 = vmul.f32 %v954_v28, %v950_v21 }
 0x22d   : > { %v379_v30 = vsel %vm351_vm1, %v1120_v29, -inf }
 0x22e   : > { %380 = vmax.xlane.f32.xlu1 %v379_v30 }
 0x2b7   : > { %v1126_v33 = vpop.xlane.xlu0 %377 }
 0x2b8   : > { %vm382_vm2 = vcmp.eq.f32.partialorder %v1116_v26, %v1126_v33 }
 0x2b9   : > { %v384_v34 = vsel %vm382_vm2, %v1124_v32, 4 }
 0x2ba   : > { %v386_v35 = vsel %vm351_vm1, %v384_v34, 2147483647 }
 0x2bb   : > { %v1132_v36 = vpop.xlane.xlu1 %380  ;;  %v388_v37 = vshra.s32 %v386_v35, 16  ;;  %v387_v43 = vand.u32 65535, %v386_v35 }
 0x2bc   : > { %vm383_vm3 = vcmp.eq.f32.partialorder %v1120_v29, %v1132_v36 }
 0x2bd   : > { %v385_v38 = vsel %vm383_vm3, %v1124_v32, 4  ;;  %v390_v39 = vcvt.s32.f32 %v388_v37  ;;  %v389_v45 = vcvt.s32.f32 %v387_v43  ;;  %vm498_vm3 = vcmp.eq.s32.totalorder %v1124_v32, 2 }
 0x2be   : > { %v401_v40 = vsel %vm351_vm1, %v385_v38, 2147483647 }
 0x2bf   : > { %391 = vmin.xlane.f32.xlu0 %v390_v39  ;;  %v403_v41 = vshra.s32 %v401_v40, 16  ;;  %v402_v46 = vand.u32 65535, %v401_v40 }
 0x2c1   : > { %v405_v42 = vcvt.s32.f32 %v403_v41  ;;  %v404_v49 = vcvt.s32.f32 %v402_v46 }
 0x2c3   : > { %406 = vmin.xlane.f32.xlu1 %v405_v42 }
 0x34c   : > { %v392_v44 = vpop.xlane.xlu0 %391 }
 0x34d   : > { %vm393_vm4 = vcmp.eq.f32.partialorder %v390_v39, %v392_v44  ;;  %v398_v51 = vcvt.f32.s32 %v392_v44 }
 0x34e   : > { %v394_v47 = vsel %vm393_vm4, %v389_v45, inf  ;;  %vm510_vm4 = vcmp.eq.s32.totalorder %v1124_v32, 3 }
 0x34f   : > { %395 = vmin.xlane.f32.xlu0 %v394_v47  ;;  %v399_v53 = vshll.u32 %v398_v51, 16 }
 0x350   : > { %v407_v48 = vpop.xlane.xlu1 %406 }
 0x351   : > { %vm408_vm5 = vcmp.eq.f32.partialorder %v405_v42, %v407_v48  ;;  %v413_v54 = vcvt.f32.s32 %v407_v48 }
 0x352   : > { %v409_v50 = vsel %vm408_vm5, %v404_v49, inf  ;;  %vm483_vm5 = vcmask 7168  }
 0x353   : > { %410 = vmin.xlane.f32.xlu1 %v409_v50  ;;  %v414_v58 = vshll.u32 %v413_v54, 16 }
 0x3dc   : > { %v396_v52 = vpop.xlane.xlu0 %395 }
 0x3dd   : > { %v397_v55 = vcvt.f32.s32 %v396_v52 }
 0x3df   : > { %v400_v56 = vadd.s32 %v399_v53, %v397_v55 }
 0x3e0   : > { %v411_v57 = vpop.xlane.xlu1 %410 }
 0x3e1   : > { %v412_v59 = vcvt.f32.s32 %v411_v57  ;;  %vm416_vm6 = vcmp.eq.s32.totalorder %v1124_v32, %v400_v56 }
 0x3e2   : > { %v420_v60 = vsel %vm416_vm6, -inf, %v1116_v26 }
 0x3e3   : > { %v415_v61 = vadd.s32 %v414_v58, %v412_v59  ;;  %v422_v62 = vsel %vm351_vm1, %v420_v60, -inf }
 0x3e4   : > { %423 = vmax.xlane.f32.xlu0 %v422_v62 }
 0x3e5   : > { %vm417_vm7 = vcmp.eq.s32.totalorder %v1124_v32, %v415_v61 }
 0x3e6   : > { %v421_v63 = vsel %vm417_vm7, -inf, %v1120_v29 }
 0x3e7   : > { %v425_v2 = vsel %vm351_vm1, %v421_v63, -inf }
 0x3e8   : > { %426 = vmax.xlane.f32.xlu1 %v425_v2 }
 0x471   : > { %v424_v3 = vpop.xlane.xlu0 %423 }
 0x472   : > { %vm428_vm8 = vcmp.eq.f32.partialorder %v420_v60, %v424_v3  ;;  %v466_v21 = vadd.f32 %v424_v3, %v1126_v33 }
 0x473   : > { %v430_v4 = vsel %vm428_vm8, %v1124_v32, 4 }
 0x474   : > { %v432_v5 = vsel %vm351_vm1, %v430_v4, 2147483647  ;;  %955 = vrcp.f32 %v466_v21 }
 0x475   : > { %v427_v6 = vpop.xlane.xlu1 %426  ;;  %v434_v7 = vshra.s32 %v432_v5, 16  ;;  %v433_v13 = vand.u32 65535, %v432_v5 }
 0x476   : > { %vm429_vm9 = vcmp.eq.f32.partialorder %v421_v63, %v427_v6  ;;  %v467_v22 = vadd.f32 %v427_v6, %v1132_v36 }
 0x477   : > { %v431_v8 = vsel %vm429_vm9, %v1124_v32, 4  ;;  %v436_v9 = vcvt.s32.f32 %v434_v7  ;;  %v435_v15 = vcvt.s32.f32 %v433_v13 }
 0x478   : > { %v447_v10 = vsel %vm351_vm1, %v431_v8, 2147483647  ;;  %957 = vrcp.f32 %v467_v22 }
 0x479   : > { %437 = vmin.xlane.f32.xlu0 %v436_v9  ;;  %v449_v11 = vshra.s32 %v447_v10, 16  ;;  %v448_v16 = vand.u32 65535, %v447_v10 }
 0x47b   : > { %v451_v12 = vcvt.s32.f32 %v449_v11  ;;  %v450_v19 = vcvt.s32.f32 %v448_v16 }
 0x47d   : > { %452 = vmin.xlane.f32.xlu1 %v451_v12 }
 0x47e   : > { %v956_v37 = vpop.eup %955 }
 0x482   : > { %v958_v40 = vpop.eup %957 }
 0x506   : > { %v438_v14 = vpop.xlane.xlu0 %437 }
 0x507   : > { %vm439_vm10 = vcmp.eq.f32.partialorder %v436_v9, %v438_v14  ;;  %v444_v23 = vcvt.f32.s32 %v438_v14 }
 0x508   : > { %v440_v17 = vsel %vm439_vm10, %v435_v15, inf }
 0x509   : > { %441 = vmin.xlane.f32.xlu0 %v440_v17  ;;  %v445_v25 = vshll.u32 %v444_v23, 16 }
 0x50a   : > { %v453_v18 = vpop.xlane.xlu1 %452 }
 0x50b   : > { %vm454_vm11 = vcmp.eq.f32.partialorder %v451_v12, %v453_v18  ;;  %v459_v27 = vcvt.f32.s32 %v453_v18 }
 0x50c   : > { %v455_v20 = vsel %vm454_vm11, %v450_v19, inf }
 0x50d   : > { %456 = vmin.xlane.f32.xlu1 %v455_v20  ;;  %v460_v34 = vshll.u32 %v459_v27, 16 }
 0x596   : > { %v442_v24 = vpop.xlane.xlu0 %441 }
 0x597   : > { %v443_v28 = vcvt.f32.s32 %v442_v24 }
 0x599   : > { %v446_v30 = vadd.s32 %v445_v25, %v443_v28 }
 0x59a   : > { %v457_v31 = vpop.xlane.xlu1 %456 }
 0x59b   : > { %vm462_vm12 = vcmp.eq.s32.totalorder %v1124_v32, %v446_v30  ;;  %v458_v35 = vcvt.f32.s32 %v457_v31 }
 0x59c   : > { %vm464_vm13 = vmor %vm416_vm6, %vm462_vm12 }
 0x59d   : > { %v468_v33 = vsel %vm464_vm13, %v1116_v26, 0.0  ;;  %v461_v38 = vadd.s32 %v460_v34, %v458_v35 }
 0x59e   : > { %v471_v36 = vmul.f32 %v956_v37, %v468_v33 }
 0x59f   : > { %vm463_vm15 = vcmp.eq.s32.totalorder %v1124_v32, %v461_v38 }
 0x5a0   : > { %vm465_vm2 = vmor %vm417_vm7, %vm463_vm15  ;;  %v475_v39 = vsel %vm474_vm14, %v471_v36, 0.0  ;;  %v487_v26 = vsel %vm486_vm0, %v471_v36, 0.0  ;;  %v499_v48 = vsel %vm498_vm3, %v471_v36, 0.0  ;;  %v511_v51 = vsel %vm510_vm4, %v471_v36, 0.0 }
 0x5a1   : > { %v469_v41 = vsel %vm465_vm2, %v1120_v29, 0.0  ;;  %v477_v42 = vsel %vm351_vm1, %v475_v39, 0.0  ;;  %v489_v46 = vsel %vm351_vm1, %v487_v26, 0.0  ;;  %v501_v49 = vsel %vm351_vm1, %v499_v48, 0.0 }
 0x5a2   : > { %v473_v43 = vmul.f32 %v958_v40, %v469_v41  ;;  %478 = vadd.xlane.f32.xlu0 %v477_v42  ;;  %v513_v53 = vsel %vm351_vm1, %v511_v51, 0.0 }
 0x5a4   : > { %v476_v44 = vsel %vm474_vm14, %v473_v43, 0.0  ;;  %v488_v47 = vsel %vm486_vm0, %v473_v43, 0.0  ;;  %v500_v50 = vsel %vm498_vm3, %v473_v43, 0.0  ;;  %v512_v54 = vsel %vm510_vm4, %v473_v43, 0.0 }
 0x5a5   : > { %v480_v45 = vsel %vm351_vm1, %v476_v44, 0.0  ;;  %v492_v29 = vsel %vm351_vm1, %v488_v47, 0.0  ;;  %v504_v52 = vsel %vm351_vm1, %v500_v50, 0.0  ;;  %v516_v55 = vsel %vm351_vm1, %v512_v54, 0.0 }
 0x5a6   : > { %481 = vadd.xlane.f32.xlu1 %v480_v45  ;;  %490 = vadd.xlane.f32.xlu0 %v489_v46 }
 0x5aa   : > { %493 = vadd.xlane.f32.xlu1 %v492_v29  ;;  %502 = vadd.xlane.f32.xlu0 %v501_v49 }
 0x5ae   : > { %505 = vadd.xlane.f32.xlu1 %v504_v52  ;;  %514 = vadd.xlane.f32.xlu0 %v513_v53 }
 0x5b2   : > { %517 = vadd.xlane.f32.xlu1 %v516_v55 }
 0x62f   : > { %v479_v32 = vpop.xlane.xlu0 %478 }
 0x630   : > { %484 = vst.msk [vmem:[#allocation2] sm:$0xff] %vm483_vm5, %v479_v32 }
 0x633   : > { %v482_v56 = vpop.xlane.xlu1 %481  ;;  %v491_v57 = vpop.xlane.xlu0 %490 }
 0x634   : > { %485 = vst.msk [vmem:[#allocation2 + $0x8] sm:$0xff] %vm483_vm5, %v482_v56  ;;  %496 = vst.msk [vmem:[#allocation2 + $0x10] sm:$0xff] %vm483_vm5, %v491_v57 }
 0x637   : > { %v494_v58 = vpop.xlane.xlu1 %493  ;;  %v503_v59 = vpop.xlane.xlu0 %502 }
 0x638   : > { %497 = vst.msk [vmem:[#allocation2 + $0x18] sm:$0xff] %vm483_vm5, %v494_v58  ;;  %508 = vst.msk [vmem:[#allocation2 + $0x20] sm:$0xff] %vm483_vm5, %v503_v59 }
 0x63b   : > { %v506_v60 = vpop.xlane.xlu1 %505  ;;  %v515_v61 = vpop.xlane.xlu0 %514 }
 0x63c   : > { %509 = vst.msk [vmem:[#allocation2 + $0x28] sm:$0xff] %vm483_vm5, %v506_v60  ;;  %520 = vst.msk [vmem:[#allocation2 + $0x30] sm:$0xff] %vm483_vm5, %v515_v61 }
 0x63f   : > { %v518_v62 = vpop.xlane.xlu1 %517 }
 0x640   : > { %521 = vst.msk [vmem:[#allocation2 + $0x38] sm:$0xff] %vm483_vm5, %v518_v62 }
 0x641 PF: > { %s843_s14 = sshll.u32 %s1014_s21, 4  ;;  %s844_s15 = sshll.u32 %s1014_s21, 6  ;;  %v1025_v63 = vmov 0.0   ;;  %vm1026_vm1 = vmmov 0   ;;  %v554_v6 = vpack.c.bf16 %v1095_v1, %v1090_v0  ;;  %vm571_vm6 = vcmask 261120  }
 0x642   : > { %874 = vmatprep.subr.bf16.mxu0 %v1025_v63  ;;  %s526_s18 = scalar_lea.vmem %s1259_s2, %s843_s14  ;;  %878 = vmatprep.mubr.msk.bf16.mxu0 %vm1026_vm1, %v1025_v63  ;;  %s1192_s26 = scalar_lea.vmem %s1261_s4, %s844_s15  ;;  %v1027_v11 = vmov 0   ;;  %v712_v31 = vld [vmem:[#allocation3] sm:$0xff]  ;;  %v713_v36 = vld [vmem:[#allocation3 + $0x8] sm:$0xff] }
 0x643   : > { %v960_v2 = vld [vmem:[%s526_s18] sm:$0xff]   ;;  %882 = vmatprep.subr.bf16.mxu1 %v1025_v63  ;;  %898 = vmatprep.mubr.msk.bf16.mxu1 %vm1026_vm1, %v1025_v63  ;;  %v961_v3 = vld [vmem:[%s526_s18 + $0x8] sm:$0xff]   ;;  %v964_v7 = vld [vmem:[%s1192_s26 + $0x10] sm:$0xff]   ;;  %s714_s27 = scalar_lea.vmem [#allocation2], %s843_s14  ;;  %s550_s30 = scalar_lea.vmem %s1260_s3, %s1014_s21 }
 0x644   : > { %875 = vmatpush3.bf16.msra.mxu0 %v960_v2  ;;  %v962_v4 = vld [vmem:[%s1192_s26] sm:$0xff]   ;;  %v963_v5 = vld [vmem:[%s1192_s26 + $0x8] sm:$0xff]   ;;  %v965_v8 = vld [vmem:[%s1192_s26 + $0x18] sm:$0xff]   ;;  %959 = vset.pattern.permute.xlu0 %v1027_v11  ;;  %s552_s9 = scalar_lea.vmem %s1262_s5, %s1014_s21  ;;  %p838_p5 = scmp.ne.s32.totalorder %s1014_s21, 3 }
 0x645   : > { %876 = vmatprep.subr.bf16.mxu0 %v1025_v63  ;;  %883 = vmatpush3.bf16.msra.mxu1 %v962_v4  ;;  %v966_v9 = vld [vmem:[%s1192_s26 + $0x20] sm:$0xff]   ;;  %v967_v10 = vld [vmem:[%s1192_s26 + $0x28] sm:$0xff]   ;;  %v968_v0 = vld [vmem:[%s1192_s26 + $0x30] sm:$0xff]  }
 0x646   : > { %884 = vmatprep.subr.bf16.mxu1 %v1025_v63  ;;  %v969_v1 = vld [vmem:[%s1192_s26 + $0x38] sm:$0xff]   ;;  %v825_v14 = vld [vmem:[%s550_s30] ss:$0 sm:$0xff] }
 0x647   : > { %v715_v12 = vld [vmem:[%s714_s27] sm:$0xff]  ;;  %v716_v13 = vld [vmem:[%s714_s27 + $0x8] sm:$0xff] }
 0x648   : > { %877 = vmatpush3.bf16.msra.mxu0 %v961_v3  ;;  %719 = vperm.xlu0 %959, %v715_v12   ;;  %v829_v25 = vld [vmem:[%s552_s9] ss:$0 sm:$0xff] }
 0x649   : > { %885 = vmatpush3.bf16.msra.mxu1 %v963_v5 }
 0x64a   : > { %886 = vmatprep.subr.bf16.mxu1 %v1025_v63 }
 0x64b   : > { %879 = vmatmul.mubr.msk.bf16.vlgmr.msra.gmra.mrb[0].mxu0 %vm571_vm6, %v554_v6 }
 0x64c   : > { %724 = vperm.xlu0 %959, %v716_v13  }
 0x64d   : > { %887 = vmatpush3.bf16.msra.mxu1 %v964_v7 }
 0x64e   : > { %888 = vmatprep.subr.bf16.mxu1 %v1025_v63 }
 0x651   : > { %889 = vmatpush3.bf16.msra.mxu1 %v965_v8 }
 0x652   : > { %890 = vmatprep.subr.bf16.mxu1 %v1025_v63 }
 0x655   : > { %891 = vmatpush3.bf16.msra.mxu1 %v966_v9 }
 0x656   : > { %892 = vmatprep.subr.bf16.mxu1 %v1025_v63 }
 0x659   : > { %893 = vmatpush3.bf16.msra.mxu1 %v967_v10 }
 0x65a   : > { %894 = vmatprep.subr.bf16.mxu1 %v1025_v63 }
 0x65d   : > { %895 = vmatpush3.bf16.msra.mxu1 %v968_v0 }
 0x65e   : > { %896 = vmatprep.subr.bf16.mxu1 %v1025_v63 }
 0x661   : > { %897 = vmatpush3.bf16.msra.mxu1 %v969_v1 }
 0x6c7   : > { %v720_v24 = vpop.permute.xlu0 %719 }
 0x6cb   : > { %v725_v38 = vpop.permute.xlu0 %724 }
 0x71e   : > { %v609_v15 = vpop.f32.mrb[0].mxu0 }
 0x71f   : > { %v610_v16 = vadd.f32 %v825_v14, %v609_v15  ;;  %v880_v17 = vpop.f32.mrb[1].mxu0 }
 0x720   : > { %v612_v18 = vpop.f32.mrb[2].mxu0 }
 0x721   : > { %v613_v19 = vadd.f32 %v825_v14, %v612_v18  ;;  %v881_v20 = vpop.f32.mrb[3].mxu0  ;;  %v616_v21 = vmax.f32 %v610_v16, 0.0 }
 0x723   : > { %v617_v22 = vmax.f32 %v613_v19, 0.0 }
 0x725   : > { %v618_v23 = vpack.c.bf16 %v617_v22, %v616_v21 }
 0x727   : > { %899 = vmatmul.mubr.bf16.vlgmr.msra.gmra.mrb[0].mxu1 %v618_v23 }
 0x7fa   : > { %v705_v27 = vpop.f32.mrb[0].mxu1 }
 0x7fb   : > { %v706_v28 = vadd.f32 %v829_v25, %v705_v27  ;;  %v900_v30 = vpop.f32.mrb[1].mxu1 }
 0x7fc   : > { %v708_v34 = vpop.f32.mrb[2].mxu1 }
 0x7fd   : > { %v727_v35 = vmul.f32 %v720_v24, %v706_v28  ;;  %v709_v37 = vadd.f32 %v829_v25, %v708_v34  ;;  %v901_v33 = vpop.f32.mrb[3].mxu1  ;;  %736 = sbr.rel (%p838_p5) target bundleno = 2060 (0x80c), region = 52 }
 0x7ff   : > { %v729_v39 = vadd.f32 %v727_v35, %v712_v31  ;;  %v728_v40 = vmul.f32 %v725_v38, %v709_v37 }
 0x801   : > { %731 = vst.msk [vmem:[#allocation3] sm:$0xff] %vm571_vm6, %v729_v39  ;;  %v730_v41 = vadd.f32 %v728_v40, %v713_v36 }
 0x803   : > { %732 = vst.msk [vmem:[#allocation3 + $0x8] sm:$0xff] %vm571_vm6, %v730_v41 }
 0x808   : > { %v737_v42 = vld [vmem:[#allocation3] sm:$0xff] }
 0x809   : > { %739 = vst.msk [vmem:[#allocation4] sm:$0xff] %vm571_vm6, %v737_v42 }
 0x80a   : > { %v738_v43 = vld [vmem:[#allocation3 + $0x8] sm:$0xff] }
 0x80b   : > { %740 = vst.msk [vmem:[#allocation4 + $0x8] sm:$0xff] %vm571_vm6, %v738_v43 }
 0x80c PF: > { %p1222_p6 = scmp.eq.s32.totalorder %s814_s24, 3  ;;  %s1028_s11 = smov [#allocation4]  }
 0x80d   : > { %s750_s12 = sshll.u32 %s1028_s11, 4  ;;  %s751_s12 = int_to_ptr.vmem [resolvable:$true] %s750_s12 }
 0x80e   : > { %s970_s13 = scalar_lea.vmem %s751_s12, 256  ;;  %p977_p10 = scmp.lt.s32.totalorder %s751_s12, %s751_s12 }
 0x80f   : > { %p971_p7 = scmp.ne.s32.totalorder %s751_s12, %s970_s13  ;;  %p978_p11 = scmp.lt.s32.totalorder %s970_s13, %s970_s13 }
 0x811   : > { %p972_p8 = pnand %p971_p7, %p1222_p6  ;;  %p979_p12 = por %p978_p11, %p977_p10 }
 0x813   : > { %p973_p9 = pneg %p972_p8 }
 0x815   : > { %p980_p13 = pnand %p979_p12, %p973_p9 }
 0x817   : > { %983 = shalt.err (!%p980_p13)
}
 0x818   : > { %s984_s24 = scalar_lea.hbm %s1263_s6, 256 }
 0x819   : > { %p985_p0 = scmp.ne.s32.totalorder %s1263_s6, %s984_s24  ;;  %p990_p3 = scmp.lt.u32.totalorder %s984_s24, %s1263_s6 }
 0x81b   : > { %p986_p1 = pnand %p985_p0, %p1222_p6 }
 0x81d   : > { %p987_p2 = pneg %p986_p1 }
 0x81f   : > { %p992_p4 = pnand %p990_p3, %p987_p2 }
 0x821   : > { %995 = shalt.err (!%p992_p4)
}
 0x822   : > { %s1029_s19 = smov 128   ;;  %s1030_s20 = smov 8  }
 0x823   : > { %911 = dma.vmem_to_hbm [thread:$0]  (%p1222_p6), %s751_s12, 256, %s1263_s6, [#allocation5], %s1029_s19, %s1029_s19, %s1030_s20  }
 0x824   : > { %1009 = dma.done.wait (%p1222_p6), [#allocation5], 256  }
 0x825   : > { %1011 = vsyncadd (%p1222_p6), [#allocation5], 4294967040 }
 0x826 PF: > { %s17_s23 = sadd.s32 1, %s1022_s23   ;;  %s1265_s21 = smov %s1018_s22 }
 0x827   : > { %p14_p5 = scmp.ge.s32.totalorder %s17_s23, 6   ;;  %s1266_s22 = smov %s1268_s25 }
 0x829   :  { %16 = sbr.rel (!%p14_p5) target bundleno = 2 (0x2), region = 88 }
 0x830   :  { %766 = vsyncpa [#allocation5], 1 }
 0x831   :  { %768 = vsyncpa [#allocation5 + $0x1], 1 }

</bundles_post_ra>
